<compile_context>
chip_gen: v5e
topology: v5e:2x2
jax: 0.10.0
libtpu: 0.0.40
codegen_flags: <defaults>
</compile_context>

<pallas_src>
import string

import jax
import jax.numpy as jnp
from jax.experimental import pallas as pl
from jax.experimental.pallas import tpu as pltpu


# -----------------------------------------------------------------------------
# Kernel: one invocation runs the whole sequence.
# -----------------------------------------------------------------------------
def rnn_seq_kernel(idx_ref,                                # SMEM (T,) int32 letter indices (scalar prefetch)
                   h0_ref,                                 # (1, H)      f32  initial hidden
                   w_in_i2h_ref, w_h_i2h_ref, b_i2h_ref,   # (I,H) f32, (H,H) bf16, (1,H) f32
                   w_in_h2o_ref, w_h_h2o_ref, b_h2o_ref,   # (I,Op) f32, (H,Op) bf16, (1,Op) f32
                   out_ref,                                # (T, Op) f32  per-step softmax (lane-padded)
                   hfin_ref,                               # (1, H)  f32  final hidden
                   hs_ref,                                 # scratch (T, H)  f32  hidden used at step t (h_{t-1})
                   gin_ref):                               # scratch (T, Op) f32  gathered W_in_h2o rows
    T = idx_ref.shape[0]
    b_i2h = b_i2h_ref[...]                                 # hoisted once

    # ---- recurrent loop: only the hidden update is on the serial chain ----
    h = h0_ref[...]                                        # (1, H) f32
    for t in range(T):                                     # T is small & static -> fully unrolled
        idx = idx_ref[t]                                   # scalar int32 from SMEM
        hs_ref[pl.ds(t, 1), :] = h                         # stash h_{t-1} for the batched h2o epilogue
        gin_ref[pl.ds(t, 1), :] = w_in_h2o_ref[pl.ds(idx, 1), :]   # one-hot @ W_in_h2o == row gather
        # hidden_t = [inp, h] @ W_i2h^T + b == W_in_i2h[idx] + h @ W_h_i2h + b
        h = (jnp.dot(h.astype(jnp.bfloat16), w_h_i2h_ref[...],
                     preferred_element_type=jnp.float32)
             + w_in_i2h_ref[pl.ds(idx, 1), :] + b_i2h)

    hfin_ref[...] = h

    # ---- batched epilogue: one matmul + one softmax for all T steps ----
    # logits_t = [inp_t, h_{t-1}] @ W_h2o^T + b  (padded lanes carry bias -1e30)
    logits = (jnp.dot(hs_ref[...].astype(jnp.bfloat16), w_h_h2o_ref[...],
                      preferred_element_type=jnp.float32)
              + gin_ref[...] + b_h2o_ref[...])
    m = jnp.max(logits, axis=-1, keepdims=True)
    e = jnp.exp(logits - m)                                # padded lanes underflow to exactly 0
    out_ref[...] = e / jnp.sum(e, axis=-1, keepdims=True)  # exact divide (off critical path)


# -----------------------------------------------------------------------------
# One-time parameter preparation (hoisted out of the forward path).
# -----------------------------------------------------------------------------
def prepare_params(params, input_size, lane=128):
    """Split/transpose PyTorch-layout Linear weights, lane-pad the output head,
    cast the MXU operands to bf16 (gather tables / biases stay f32)."""
    H = params["i2h_b"].shape[0]
    O = params["h2o_b"].shape[0]
    O_pad = ((O + lane - 1) // lane) * lane

    i2h_w = params["i2h_w"]                                 # (H, I+H)  PyTorch (out, in)
    h2o_w = params["h2o_w"]                                 # (O, I+H)

    w_in_i2h = jnp.asarray(i2h_w[:, :input_size].T, jnp.float32)            # (I, H)   gather table
    w_h_i2h = jnp.asarray(i2h_w[:, input_size:].T, jnp.float32).astype(jnp.bfloat16)   # (H, H)

    w_in_h2o = (jnp.zeros((input_size, O_pad), jnp.float32)
                .at[:, :O].set(h2o_w[:, :input_size].T))                    # (I, O_pad) gather table
    w_h_h2o = (jnp.zeros((H, O_pad), jnp.float32)
               .at[:, :O].set(h2o_w[:, input_size:].T)).astype(jnp.bfloat16)  # (H, O_pad)

    b_i2h = params["i2h_b"].reshape(1, H).astype(jnp.float32)
    # -1e30 in padded lanes -> exp(pad - max) == 0 -> padded softmax lanes are exactly 0.
    b_h2o = jnp.full((1, O_pad), -1e30, jnp.float32).at[0, :O].set(params["h2o_b"])

    return {
        "w_in_i2h": w_in_i2h, "w_h_i2h": w_h_i2h, "b_i2h": b_i2h,
        "w_in_h2o": w_in_h2o, "w_h_h2o": w_h_h2o, "b_h2o": b_h2o,
        "O": O, "O_pad": O_pad, "H": H, "I": input_size,
    }


# -----------------------------------------------------------------------------
# Fused-sequence forward: ONE pallas_call for all T steps.
# -----------------------------------------------------------------------------
def rnn_forward_sequence(letter_indices, h0, kp):
    """
    letter_indices: (T,) int32 — one-hot input exploited as a row gather.
    h0:             (1, H) float32 initial hidden (initHidden()).
    Returns (outputs (T, 1, O) softmax per step, final hidden (1, H)).
    """
    T = int(letter_indices.shape[0])
    B, H = h0.shape
    assert B == 1, "module semantics: batch = 1 (lineTotensor emits (seq, 1, n_letters))"
    I, O, O_pad = kp["I"], kp["O"], kp["O_pad"]

    # Clamp to the valid row range: all_letters.find() returns -1 for unknown chars,
    # which would be an unchecked OOB VMEM gather inside the kernel.
    idx = jnp.clip(letter_indices.astype(jnp.int32), 0, I - 1)

    const = lambda i, idx_ref: (0, 0)   # everything stays VMEM-resident, written/read once

    outs_pad, h_final = pl.pallas_call(
        rnn_seq_kernel,
        out_shape=(
            jax.ShapeDtypeStruct((T, O_pad), jnp.float32),   # per-step softmax (lane-padded)
            jax.ShapeDtypeStruct((B, H), jnp.float32),       # final hidden
        ),
        grid_spec=pltpu.PrefetchScalarGridSpec(
            num_scalar_prefetch=1,
            grid=(1,),                                       # single invocation: no per-step grid overhead
            in_specs=[
                pl.BlockSpec((B, H), const),                 # h0
                pl.BlockSpec(kp["w_in_i2h"].shape, const),   # (I, H)
                pl.BlockSpec(kp["w_h_i2h"].shape, const),    # (H, H)
                pl.BlockSpec((1, H), const),                 # b_i2h
                pl.BlockSpec(kp["w_in_h2o"].shape, const),   # (I, O_pad)
                pl.BlockSpec(kp["w_h_h2o"].shape, const),    # (H, O_pad)
                pl.BlockSpec((1, O_pad), const),             # b_h2o
            ],
            out_specs=(
                pl.BlockSpec((T, O_pad), const),
                pl.BlockSpec((B, H), const),
            ),
            scratch_shapes=[
                pltpu.VMEM((T, H), jnp.float32),             # hs: h_{t-1} rows
                pltpu.VMEM((T, O_pad), jnp.float32),         # gin: gathered W_in_h2o rows
            ],
        ),
        compiler_params=pltpu.CompilerParams(
            dimension_semantics=("arbitrary",)),
    )(idx, h0,
      kp["w_in_i2h"], kp["w_h_i2h"], kp["b_i2h"],
      kp["w_in_h2o"], kp["w_h_h2o"], kp["b_h2o"])

    return outs_pad[:, :O].reshape(T, 1, O), h_final


# -----------------------------------------------------------------------------
# Parameter init mimicking nn.Linear default (uniform +-1/sqrt(fan_in)), PyTorch layout.
# -----------------------------------------------------------------------------
def init_params(key, input_size, hidden_size, output_size):
    k1, k2, k3, k4 = jax.random.split(key, 4)
    fan_in = input_size + hidden_size
    bound = 1.0 / jnp.sqrt(fan_in)
    return {
        "i2h_w": jax.random.uniform(k1, (hidden_size, fan_in), jnp.float32, -bound, bound),
        "i2h_b": jax.random.uniform(k2, (hidden_size,), jnp.float32, -bound, bound),
        "h2o_w": jax.random.uniform(k3, (output_size, fan_in), jnp.float32, -bound, bound),
        "h2o_b": jax.random.uniform(k4, (output_size,), jnp.float32, -bound, bound),
    }


if __name__ == "__main__":
    # Module-implied sizes: one-hot letters -> hidden 128 -> category count.
    all_letters = string.ascii_letters + ".,;'"
    n_letters = len(all_letters)      # 57  (input_size)
    n_hidden = 128                    # hidden_size
    n_categories = 18                 # output_size (classic name-classification setup)
    line = "Albert"
    T = len(line)

    letter_indices = jnp.array([all_letters.find(c) for c in line], dtype=jnp.int32)

    key = jax.random.PRNGKey(0)
    params = init_params(key, n_letters, n_hidden, n_categories)     # PyTorch layout
    kparams = prepare_params(params, n_letters)                      # one-time prep (hoisted)

    h0 = jnp.zeros((1, n_hidden), jnp.float32)                       # initHidden()

    outs, h_final = rnn_forward_sequence(letter_indices, h0, kparams)
    jax.block_until_ready((outs, h_final))

    # ---- Pure-JAX reference implementing the PyTorch module step-by-step ----
    def ref_step(inp, hidden):
        combined = jnp.concatenate([inp, hidden], axis=1)
        new_hidden = jnp.dot(combined, params["i2h_w"].T,
                             precision=jax.lax.Precision.HIGHEST) + params["i2h_b"]
        logits = jnp.dot(combined, params["h2o_w"].T,
                         precision=jax.lax.Precision.HIGHEST) + params["h2o_b"]
        return jax.nn.softmax(logits, axis=1), new_hidden

    hidden_ref = h0
    ref_outs = []
    for t in range(T):
        inp = jax.nn.one_hot(letter_indices[t], n_letters, dtype=jnp.float32).reshape(1, -1)
        o, hidden_ref = ref_step(inp, hidden_ref)
        ref_outs.append(o)
    ref_outs = jnp.stack(ref_outs)                                   # (T, 1, O)

    # Shapes match the PyTorch module (per step: (1, O) softmax, (1, H) hidden).
    assert outs.shape == (T, 1, n_categories)
    assert h_final.shape == (1, n_hidden)
    # Softmax rows sum to 1 (exact divide -> f32 rounding only).
    assert bool(jnp.allclose(jnp.sum(outs, axis=-1), 1.0, atol=1e-3))
    # Numerical parity with the reference module (bf16 MXU operands, f32 accumulation).
    assert bool(jnp.allclose(outs, ref_outs, atol=2e-3, rtol=2e-3))
    assert bool(jnp.allclose(h_final, hidden_ref, atol=5e-3, rtol=5e-3))

    # TODO(synk): tutorial variants use LogSoftmax + NLLLoss; this module uses Softmax,
    # which is what the kernel reproduces.
    print("KERNEL_OK")
</pallas_src>

<mosaic_0001>
module attributes {stable_mosaic.version = 11 : i64} {
  func.func @rnn_seq_kernel(%arg0: i32, %arg1: memref<6xi32, #tpu.memory_space<smem>>, %arg2: memref<1x128xf32, #tpu.memory_space<vmem>>, %arg3: memref<56x128xf32, #tpu.memory_space<vmem>>, %arg4: memref<128x128xbf16, #tpu.memory_space<vmem>>, %arg5: memref<1x128xf32, #tpu.memory_space<vmem>>, %arg6: memref<56x128xf32, #tpu.memory_space<vmem>>, %arg7: memref<128x128xbf16, #tpu.memory_space<vmem>>, %arg8: memref<1x128xf32, #tpu.memory_space<vmem>>, %arg9: memref<6x128xf32, #tpu.memory_space<vmem>>, %arg10: memref<1x128xf32, #tpu.memory_space<vmem>>, %arg11: memref<6x128xf32, #tpu.memory_space<vmem>>, %arg12: memref<6x128xf32, #tpu.memory_space<vmem>>) attributes {dimension_semantics = [#tpu.dimension_semantics<arbitrary>], iteration_bounds = array<i64: 1>, scalar_prefetch = 1 : i64, scratch_operands = 2 : i64, tpu.core_type = #tpu.core_type<tc>, window_params = [{pipeline_mode = #tpu.pipeline_mode<synchronous>, transform_indices = @transform_0, window_bounds = array<i64: 1, 128>}, {pipeline_mode = #tpu.pipeline_mode<synchronous>, transform_indices = @transform_1, window_bounds = array<i64: 56, 128>}, {pipeline_mode = #tpu.pipeline_mode<synchronous>, transform_indices = @transform_2, window_bounds = array<i64: 128, 128>}, {pipeline_mode = #tpu.pipeline_mode<synchronous>, transform_indices = @transform_3, window_bounds = array<i64: 1, 128>}, {pipeline_mode = #tpu.pipeline_mode<synchronous>, transform_indices = @transform_4, window_bounds = array<i64: 56, 128>}, {pipeline_mode = #tpu.pipeline_mode<synchronous>, transform_indices = @transform_5, window_bounds = array<i64: 128, 128>}, {pipeline_mode = #tpu.pipeline_mode<synchronous>, transform_indices = @transform_6, window_bounds = array<i64: 1, 128>}, {pipeline_mode = #tpu.pipeline_mode<synchronous>, transform_indices = @transform_7, window_bounds = array<i64: 6, 128>}, {pipeline_mode = #tpu.pipeline_mode<synchronous>, transform_indices = @transform_8, window_bounds = array<i64: 1, 128>}]} {
    %c0 = arith.constant 0 : index
    %c0_0 = arith.constant 0 : index
    %0 = vector.load %arg5[%c0, %c0_0] : memref<1x128xf32, #tpu.memory_space<vmem>>, vector<1x128xf32>
    %c0_1 = arith.constant 0 : index
    %c0_2 = arith.constant 0 : index
    %1 = vector.load %arg2[%c0_1, %c0_2] : memref<1x128xf32, #tpu.memory_space<vmem>>, vector<1x128xf32>
    %c0_3 = arith.constant 0 : index
    %2 = memref.load %arg1[%c0_3] : memref<6xi32, #tpu.memory_space<smem>>
    %c0_4 = arith.constant 0 : index
    %c0_5 = arith.constant 0 : index
    %3 = vector.load %arg11[%c0_4, %c0_5] : memref<6x128xf32, #tpu.memory_space<vmem>>, vector<1x128xf32>
    tpu.vector_store %arg11[%c0_4, %c0_5], %1 {strides = array<i32>} : memref<6x128xf32, #tpu.memory_space<vmem>>, vector<1x128xf32>,
    %4 = arith.index_cast %2 : i32 to index
    %c0_6 = arith.constant 0 : index
    %5 = vector.load %arg6[%4, %c0_6] : memref<56x128xf32, #tpu.memory_space<vmem>>, vector<1x128xf32>
    %c0_7 = arith.constant 0 : index
    %c0_8 = arith.constant 0 : index
    %6 = vector.load %arg12[%c0_7, %c0_8] : memref<6x128xf32, #tpu.memory_space<vmem>>, vector<1x128xf32>
    tpu.vector_store %arg12[%c0_7, %c0_8], %5 {strides = array<i32>} : memref<6x128xf32, #tpu.memory_space<vmem>>, vector<1x128xf32>,
    %7 = arith.truncf %1 : vector<1x128xf32> to vector<1x128xbf16>
    %c0_9 = arith.constant 0 : index
    %c0_10 = arith.constant 0 : index
    %8 = vector.load %arg4[%c0_9, %c0_10] : memref<128x128xbf16, #tpu.memory_space<vmem>>, vector<128x128xbf16>
    %cst = arith.constant dense<0.000000e+00> : vector<1x128xf32>
    %9 = tpu.matmul %7, %8, %cst {dimension_numbers = #tpu.dot_dimension_numbers<[1], [0], [0], [1], [0, 0, 1, 1], [], []>} : vector<1x128xbf16>, vector<128x128xbf16>, vector<1x128xf32> -> vector<1x128xf32>
    %10 = arith.index_cast %2 : i32 to index
    %c0_11 = arith.constant 0 : index
    %11 = vector.load %arg3[%10, %c0_11] : memref<56x128xf32, #tpu.memory_space<vmem>>, vector<1x128xf32>
    %12 = arith.addf %9, %11 : vector<1x128xf32>
    %13 = arith.addf %12, %0 : vector<1x128xf32>
    %c1 = arith.constant 1 : index
    %14 = memref.load %arg1[%c1] : memref<6xi32, #tpu.memory_space<smem>>
    %c1_12 = arith.constant 1 : index
    %c0_13 = arith.constant 0 : index
    %15 = vector.load %arg11[%c1_12, %c0_13] : memref<6x128xf32, #tpu.memory_space<vmem>>, vector<1x128xf32>
    tpu.vector_store %arg11[%c1_12, %c0_13], %13 {strides = array<i32>} : memref<6x128xf32, #tpu.memory_space<vmem>>, vector<1x128xf32>,
    %16 = arith.index_cast %14 : i32 to index
    %c0_14 = arith.constant 0 : index
    %17 = vector.load %arg6[%16, %c0_14] : memref<56x128xf32, #tpu.memory_space<vmem>>, vector<1x128xf32>
    %c1_15 = arith.constant 1 : index
    %c0_16 = arith.constant 0 : index
    %18 = vector.load %arg12[%c1_15, %c0_16] : memref<6x128xf32, #tpu.memory_space<vmem>>, vector<1x128xf32>
    tpu.vector_store %arg12[%c1_15, %c0_16], %17 {strides = array<i32>} : memref<6x128xf32, #tpu.memory_space<vmem>>, vector<1x128xf32>,
    %19 = arith.truncf %13 : vector<1x128xf32> to vector<1x128xbf16>
    %c0_17 = arith.constant 0 : index
    %c0_18 = arith.constant 0 : index
    %20 = vector.load %arg4[%c0_17, %c0_18] : memref<128x128xbf16, #tpu.memory_space<vmem>>, vector<128x128xbf16>
    %cst_19 = arith.constant dense<0.000000e+00> : vector<1x128xf32>
    %21 = tpu.matmul %19, %20, %cst_19 {dimension_numbers = #tpu.dot_dimension_numbers<[1], [0], [0], [1], [0, 0, 1, 1], [], []>} : vector<1x128xbf16>, vector<128x128xbf16>, vector<1x128xf32> -> vector<1x128xf32>
    %22 = arith.index_cast %14 : i32 to index
    %c0_20 = arith.constant 0 : index
    %23 = vector.load %arg3[%22, %c0_20] : memref<56x128xf32, #tpu.memory_space<vmem>>, vector<1x128xf32>
    %24 = arith.addf %21, %23 : vector<1x128xf32>
    %25 = arith.addf %24, %0 : vector<1x128xf32>
    %c2 = arith.constant 2 : index
    %26 = memref.load %arg1[%c2] : memref<6xi32, #tpu.memory_space<smem>>
    %c2_21 = arith.constant 2 : index
    %c0_22 = arith.constant 0 : index
    %27 = vector.load %arg11[%c2_21, %c0_22] : memref<6x128xf32, #tpu.memory_space<vmem>>, vector<1x128xf32>
    tpu.vector_store %arg11[%c2_21, %c0_22], %25 {strides = array<i32>} : memref<6x128xf32, #tpu.memory_space<vmem>>, vector<1x128xf32>,
    %28 = arith.index_cast %26 : i32 to index
    %c0_23 = arith.constant 0 : index
    %29 = vector.load %arg6[%28, %c0_23] : memref<56x128xf32, #tpu.memory_space<vmem>>, vector<1x128xf32>
    %c2_24 = arith.constant 2 : index
    %c0_25 = arith.constant 0 : index
    %30 = vector.load %arg12[%c2_24, %c0_25] : memref<6x128xf32, #tpu.memory_space<vmem>>, vector<1x128xf32>
    tpu.vector_store %arg12[%c2_24, %c0_25], %29 {strides = array<i32>} : memref<6x128xf32, #tpu.memory_space<vmem>>, vector<1x128xf32>,
    %31 = arith.truncf %25 : vector<1x128xf32> to vector<1x128xbf16>
    %c0_26 = arith.constant 0 : index
    %c0_27 = arith.constant 0 : index
    %32 = vector.load %arg4[%c0_26, %c0_27] : memref<128x128xbf16, #tpu.memory_space<vmem>>, vector<128x128xbf16>
    %cst_28 = arith.constant dense<0.000000e+00> : vector<1x128xf32>
    %33 = tpu.matmul %31, %32, %cst_28 {dimension_numbers = #tpu.dot_dimension_numbers<[1], [0], [0], [1], [0, 0, 1, 1], [], []>} : vector<1x128xbf16>, vector<128x128xbf16>, vector<1x128xf32> -> vector<1x128xf32>
    %34 = arith.index_cast %26 : i32 to index
    %c0_29 = arith.constant 0 : index
    %35 = vector.load %arg3[%34, %c0_29] : memref<56x128xf32, #tpu.memory_space<vmem>>, vector<1x128xf32>
    %36 = arith.addf %33, %35 : vector<1x128xf32>
    %37 = arith.addf %36, %0 : vector<1x128xf32>
    %c3 = arith.constant 3 : index
    %38 = memref.load %arg1[%c3] : memref<6xi32, #tpu.memory_space<smem>>
    %c3_30 = arith.constant 3 : index
    %c0_31 = arith.constant 0 : index
    %39 = vector.load %arg11[%c3_30, %c0_31] : memref<6x128xf32, #tpu.memory_space<vmem>>, vector<1x128xf32>
    tpu.vector_store %arg11[%c3_30, %c0_31], %37 {strides = array<i32>} : memref<6x128xf32, #tpu.memory_space<vmem>>, vector<1x128xf32>,
    %40 = arith.index_cast %38 : i32 to index
    %c0_32 = arith.constant 0 : index
    %41 = vector.load %arg6[%40, %c0_32] : memref<56x128xf32, #tpu.memory_space<vmem>>, vector<1x128xf32>
    %c3_33 = arith.constant 3 : index
    %c0_34 = arith.constant 0 : index
    %42 = vector.load %arg12[%c3_33, %c0_34] : memref<6x128xf32, #tpu.memory_space<vmem>>, vector<1x128xf32>
    tpu.vector_store %arg12[%c3_33, %c0_34], %41 {strides = array<i32>} : memref<6x128xf32, #tpu.memory_space<vmem>>, vector<1x128xf32>,
    %43 = arith.truncf %37 : vector<1x128xf32> to vector<1x128xbf16>
    %c0_35 = arith.constant 0 : index
    %c0_36 = arith.constant 0 : index
    %44 = vector.load %arg4[%c0_35, %c0_36] : memref<128x128xbf16, #tpu.memory_space<vmem>>, vector<128x128xbf16>
    %cst_37 = arith.constant dense<0.000000e+00> : vector<1x128xf32>
    %45 = tpu.matmul %43, %44, %cst_37 {dimension_numbers = #tpu.dot_dimension_numbers<[1], [0], [0], [1], [0, 0, 1, 1], [], []>} : vector<1x128xbf16>, vector<128x128xbf16>, vector<1x128xf32> -> vector<1x128xf32>
    %46 = arith.index_cast %38 : i32 to index
    %c0_38 = arith.constant 0 : index
    %47 = vector.load %arg3[%46, %c0_38] : memref<56x128xf32, #tpu.memory_space<vmem>>, vector<1x128xf32>
    %48 = arith.addf %45, %47 : vector<1x128xf32>
    %49 = arith.addf %48, %0 : vector<1x128xf32>
    %c4 = arith.constant 4 : index
    %50 = memref.load %arg1[%c4] : memref<6xi32, #tpu.memory_space<smem>>
    %c4_39 = arith.constant 4 : index
    %c0_40 = arith.constant 0 : index
    %51 = vector.load %arg11[%c4_39, %c0_40] : memref<6x128xf32, #tpu.memory_space<vmem>>, vector<1x128xf32>
    tpu.vector_store %arg11[%c4_39, %c0_40], %49 {strides = array<i32>} : memref<6x128xf32, #tpu.memory_space<vmem>>, vector<1x128xf32>,
    %52 = arith.index_cast %50 : i32 to index
    %c0_41 = arith.constant 0 : index
    %53 = vector.load %arg6[%52, %c0_41] : memref<56x128xf32, #tpu.memory_space<vmem>>, vector<1x128xf32>
    %c4_42 = arith.constant 4 : index
    %c0_43 = arith.constant 0 : index
    %54 = vector.load %arg12[%c4_42, %c0_43] : memref<6x128xf32, #tpu.memory_space<vmem>>, vector<1x128xf32>
    tpu.vector_store %arg12[%c4_42, %c0_43], %53 {strides = array<i32>} : memref<6x128xf32, #tpu.memory_space<vmem>>, vector<1x128xf32>,
    %55 = arith.truncf %49 : vector<1x128xf32> to vector<1x128xbf16>
    %c0_44 = arith.constant 0 : index
    %c0_45 = arith.constant 0 : index
    %56 = vector.load %arg4[%c0_44, %c0_45] : memref<128x128xbf16, #tpu.memory_space<vmem>>, vector<128x128xbf16>
    %cst_46 = arith.constant dense<0.000000e+00> : vector<1x128xf32>
    %57 = tpu.matmul %55, %56, %cst_46 {dimension_numbers = #tpu.dot_dimension_numbers<[1], [0], [0], [1], [0, 0, 1, 1], [], []>} : vector<1x128xbf16>, vector<128x128xbf16>, vector<1x128xf32> -> vector<1x128xf32>
    %58 = arith.index_cast %50 : i32 to index
    %c0_47 = arith.constant 0 : index
    %59 = vector.load %arg3[%58, %c0_47] : memref<56x128xf32, #tpu.memory_space<vmem>>, vector<1x128xf32>
    %60 = arith.addf %57, %59 : vector<1x128xf32>
    %61 = arith.addf %60, %0 : vector<1x128xf32>
    %c5 = arith.constant 5 : index
    %62 = memref.load %arg1[%c5] : memref<6xi32, #tpu.memory_space<smem>>
    %c5_48 = arith.constant 5 : index
    %c0_49 = arith.constant 0 : index
    %63 = vector.load %arg11[%c5_48, %c0_49] : memref<6x128xf32, #tpu.memory_space<vmem>>, vector<1x128xf32>
    tpu.vector_store %arg11[%c5_48, %c0_49], %61 {strides = array<i32>} : memref<6x128xf32, #tpu.memory_space<vmem>>, vector<1x128xf32>,
    %64 = arith.index_cast %62 : i32 to index
    %c0_50 = arith.constant 0 : index
    %65 = vector.load %arg6[%64, %c0_50] : memref<56x128xf32, #tpu.memory_space<vmem>>, vector<1x128xf32>
    %c5_51 = arith.constant 5 : index
    %c0_52 = arith.constant 0 : index
    %66 = vector.load %arg12[%c5_51, %c0_52] : memref<6x128xf32, #tpu.memory_space<vmem>>, vector<1x128xf32>
    tpu.vector_store %arg12[%c5_51, %c0_52], %65 {strides = array<i32>} : memref<6x128xf32, #tpu.memory_space<vmem>>, vector<1x128xf32>,
    %67 = arith.truncf %61 : vector<1x128xf32> to vector<1x128xbf16>
    %c0_53 = arith.constant 0 : index
    %c0_54 = arith.constant 0 : index
    %68 = vector.load %arg4[%c0_53, %c0_54] : memref<128x128xbf16, #tpu.memory_space<vmem>>, vector<128x128xbf16>
    %cst_55 = arith.constant dense<0.000000e+00> : vector<1x128xf32>
    %69 = tpu.matmul %67, %68, %cst_55 {dimension_numbers = #tpu.dot_dimension_numbers<[1], [0], [0], [1], [0, 0, 1, 1], [], []>} : vector<1x128xbf16>, vector<128x128xbf16>, vector<1x128xf32> -> vector<1x128xf32>
    %70 = arith.index_cast %62 : i32 to index
    %c0_56 = arith.constant 0 : index
    %71 = vector.load %arg3[%70, %c0_56] : memref<56x128xf32, #tpu.memory_space<vmem>>, vector<1x128xf32>
    %72 = arith.addf %69, %71 : vector<1x128xf32>
    %73 = arith.addf %72, %0 : vector<1x128xf32>
    %c0_57 = arith.constant 0 : index
    %c0_58 = arith.constant 0 : index
    %74 = vector.load %arg10[%c0_57, %c0_58] : memref<1x128xf32, #tpu.memory_space<vmem>>, vector<1x128xf32>
    tpu.vector_store %arg10[%c0_57, %c0_58], %73 {strides = array<i32>} : memref<1x128xf32, #tpu.memory_space<vmem>>, vector<1x128xf32>,
    %c0_59 = arith.constant 0 : index
    %c0_60 = arith.constant 0 : index
    %75 = vector.load %arg11[%c0_59, %c0_60] : memref<6x128xf32, #tpu.memory_space<vmem>>, vector<6x128xf32>
    %76 = arith.truncf %75 : vector<6x128xf32> to vector<6x128xbf16>
    %c0_61 = arith.constant 0 : index
    %c0_62 = arith.constant 0 : index
    %77 = vector.load %arg7[%c0_61, %c0_62] : memref<128x128xbf16, #tpu.memory_space<vmem>>, vector<128x128xbf16>
    %cst_63 = arith.constant dense<0.000000e+00> : vector<6x128xf32>
    %78 = tpu.matmul %76, %77, %cst_63 {dimension_numbers = #tpu.dot_dimension_numbers<[1], [0], [0], [1], [0, 0, 1, 1], [], []>} : vector<6x128xbf16>, vector<128x128xbf16>, vector<6x128xf32> -> vector<6x128xf32>
    %c0_64 = arith.constant 0 : index
    %c0_65 = arith.constant 0 : index
    %79 = vector.load %arg12[%c0_64, %c0_65] : memref<6x128xf32, #tpu.memory_space<vmem>>, vector<6x128xf32>
    %80 = arith.addf %78, %79 : vector<6x128xf32>
    %c0_66 = arith.constant 0 : index
    %c0_67 = arith.constant 0 : index
    %81 = vector.load %arg8[%c0_66, %c0_67] : memref<1x128xf32, #tpu.memory_space<vmem>>, vector<1x128xf32>
    %82 = vector.broadcast %81 : vector<1x128xf32> to vector<6x128xf32>
    %83 = arith.addf %80, %82 : vector<6x128xf32>
    %cst_68 = arith.constant dense<0xFF800000> : vector<6xf32>
    %84 = vector.multi_reduction <maximumf>, %83, %cst_68 [1] : vector<6x128xf32> to vector<6xf32>
    %85 = vector.shape_cast %84 : vector<6xf32> to vector<6x1xf32>
    %86 = vector.broadcast %85 : vector<6x1xf32> to vector<6x128xf32>
    %87 = arith.subf %83, %86 : vector<6x128xf32>
    %88 = math.exp %87 : vector<6x128xf32>
    %cst_69 = arith.constant dense<0.000000e+00> : vector<6xf32>
    %89 = vector.multi_reduction <add>, %88, %cst_69 [1] : vector<6x128xf32> to vector<6xf32>
    %90 = vector.shape_cast %89 : vector<6xf32> to vector<6x1xf32>
    %91 = vector.broadcast %90 : vector<6x1xf32> to vector<6x128xf32>
    %92 = arith.divf %88, %91 : vector<6x128xf32>
    %c0_70 = arith.constant 0 : index
    %c0_71 = arith.constant 0 : index
    %93 = vector.load %arg9[%c0_70, %c0_71] : memref<6x128xf32, #tpu.memory_space<vmem>>, vector<6x128xf32>
    tpu.vector_store %arg9[%c0_70, %c0_71], %92 {strides = array<i32>} : memref<6x128xf32, #tpu.memory_space<vmem>>, vector<6x128xf32>,
    return
  }
  func.func @transform_0(%arg0: i32, %arg1: memref<6xi32, #tpu.memory_space<smem>>) -> (i32, i32) {
    %c0_i32 = arith.constant 0 : i32
    %c0_i32_0 = arith.constant 0 : i32
    %c0_i32_1 = arith.constant 0 : i32
    return %c0_i32, %c0_i32_0 : i32, i32
  }
  func.func @transform_1(%arg0: i32, %arg1: memref<6xi32, #tpu.memory_space<smem>>) -> (i32, i32) {
    %c0_i32 = arith.constant 0 : i32
    %c0_i32_0 = arith.constant 0 : i32
    %c0_i32_1 = arith.constant 0 : i32
    return %c0_i32, %c0_i32_0 : i32, i32
  }
  func.func @transform_2(%arg0: i32, %arg1: memref<6xi32, #tpu.memory_space<smem>>) -> (i32, i32) {
    %c0_i32 = arith.constant 0 : i32
    %c0_i32_0 = arith.constant 0 : i32
    %c0_i32_1 = arith.constant 0 : i32
    return %c0_i32, %c0_i32_0 : i32, i32
  }
  func.func @transform_3(%arg0: i32, %arg1: memref<6xi32, #tpu.memory_space<smem>>) -> (i32, i32) {
    %c0_i32 = arith.constant 0 : i32
    %c0_i32_0 = arith.constant 0 : i32
    %c0_i32_1 = arith.constant 0 : i32
    return %c0_i32, %c0_i32_0 : i32, i32
  }
  func.func @transform_4(%arg0: i32, %arg1: memref<6xi32, #tpu.memory_space<smem>>) -> (i32, i32) {
    %c0_i32 = arith.constant 0 : i32
    %c0_i32_0 = arith.constant 0 : i32
    %c0_i32_1 = arith.constant 0 : i32
    return %c0_i32, %c0_i32_0 : i32, i32
  }
  func.func @transform_5(%arg0: i32, %arg1: memref<6xi32, #tpu.memory_space<smem>>) -> (i32, i32) {
    %c0_i32 = arith.constant 0 : i32
    %c0_i32_0 = arith.constant 0 : i32
    %c0_i32_1 = arith.constant 0 : i32
    return %c0_i32, %c0_i32_0 : i32, i32
  }
  func.func @transform_6(%arg0: i32, %arg1: memref<6xi32, #tpu.memory_space<smem>>) -> (i32, i32) {
    %c0_i32 = arith.constant 0 : i32
    %c0_i32_0 = arith.constant 0 : i32
    %c0_i32_1 = arith.constant 0 : i32
    return %c0_i32, %c0_i32_0 : i32, i32
  }
  func.func @transform_7(%arg0: i32, %arg1: memref<6xi32, #tpu.memory_space<smem>>) -> (i32, i32) {
    %c0_i32 = arith.constant 0 : i32
    %c0_i32_0 = arith.constant 0 : i32
    %c0_i32_1 = arith.constant 0 : i32
    return %c0_i32, %c0_i32_0 : i32, i32
  }
  func.func @transform_8(%arg0: i32, %arg1: memref<6xi32, #tpu.memory_space<smem>>) -> (i32, i32) {
    %c0_i32 = arith.constant 0 : i32
    %c0_i32_0 = arith.constant 0 : i32
    %c0_i32_1 = arith.constant 0 : i32
    return %c0_i32, %c0_i32_0 : i32, i32
  }
}

</mosaic_0001>

<bundles_post_ra>
// kernel: tpu_custom_call.1
= control target key start
LH: loop header
LB: loop body
LE: loop exit
PB: predicated region body
PF: predicated region fallthrough
CT: control target
= control target key end

     0   :  { %s1286_s12 = smov [#allocation5]   ;;  %s1406_s0 = inlined_call_operand.hbm [shape: s32[6], index: 0, kind: input, shape index: {}]   ;;  %s1407_s1 = inlined_call_operand.hbm [shape: f32[1,128], index: 1, kind: input, shape index: {}]   ;;  %s1408_s2 = inlined_call_operand.hbm [shape: f32[56,128], index: 2, kind: input, shape index: {}]   ;;  %s1409_s3 = inlined_call_operand.hbm [shape: bf16[128,128], index: 3, kind: input, shape index: {}]   ;;  %s1410_s4 = inlined_call_operand.vmem [shape: f32[1,128], index: 4, kind: input, shape index: {}]   ;;  %s1411_s5 = inlined_call_operand.hbm [shape: f32[56,128], index: 5, kind: input, shape index: {}]   ;;  %s1412_s6 = inlined_call_operand.hbm [shape: bf16[128,128], index: 6, kind: input, shape index: {}]   ;;  %s1413_s7 = inlined_call_operand.vmem [shape: f32[1,128], index: 7, kind: input, shape index: {}]   ;;  %s1414_s8 = inlined_call_operand.hbm [shape: f32[6,128], index: 8, kind: output, shape index: {0}]   ;;  %s1415_s9 = inlined_call_operand.hbm [shape: f32[1,128], index: 9, kind: output, shape index: {1}]  }
   0x1   :  { %s16_s11 = sshll.u32 %s1406_s0, 4  ;;  %s17_s11 = int_to_ptr.hbm [resolvable:$true] %s16_s11 }
   0x2   :  { %19 = dma.hbm_to_smem %s17_s11, 16, %s1286_s12, [#allocation4] }
   0x3   :  { %1274 = dma.done.wait [#allocation4], 16 }
   0x4   :  { %1275 = vsyncadd [#allocation4], 4294967280 }
   0x5   :  { %22 = sfence }
   0x6   :  { %23 = vsyncpa [#allocation7], 0 }
   0x7   :  { %24 = vsyncpa [#allocation10], 0 }
   0x8   :  { %25 = vsyncpa [#allocation13], 0 }
   0x9   :  { %26 = vsyncpa [#allocation8], 0  ;;  %s43_s15 = sshll.u32 %s1408_s2, 4  ;;  %s44_s15 = int_to_ptr.hbm [resolvable:$true] %s43_s15 }
   0xa   :  { %27 = vsyncpa [#allocation17], 0  ;;  %s1287_s16 = smov [#allocation9]   ;;  %s71_s19 = sshll.u32 %s1411_s5, 4  ;;  %s72_s19 = int_to_ptr.hbm [resolvable:$true] %s71_s19 }
   0xb   :  { %s45_s17 = sshll.u32 %s1287_s16, 4  ;;  %s1288_s20 = smov 128   ;;  %s46_s17 = int_to_ptr.vmem [resolvable:$true] %s45_s17 }
   0xc   :  { %s1289_s21 = smov 8   ;;  %s1290_s22 = smov [#allocation12]  }
   0xd   :  { %51 = dma.hbm_to_vmem [thread:$0]  %s44_s15, 896, %s46_s17, [#allocation10], %s1288_s20, %s1288_s20, %s1289_s21  }
   0xe   :  { %s73_s23 = sshll.u32 %s1290_s22, 4  ;;  %s33_s26 = sshll.u32 %s1407_s1, 4  ;;  %s74_s23 = int_to_ptr.vmem [resolvable:$true] %s73_s23  ;;  %s34_s26 = int_to_ptr.hbm [resolvable:$true] %s33_s26 }
   0xf   :  { %79 = dma.hbm_to_vmem [thread:$0]  %s72_s19, 896, %s74_s23, [#allocation13], %s1288_s20, %s1288_s20, %s1289_s21  }
  0x10   :  { %s56_s28 = sshll.u32 %s1409_s3, 4  ;;  %s1291_s29 = smov [#allocation6]   ;;  %s57_s28 = int_to_ptr.hbm [resolvable:$true] %s56_s28 }
  0x11   :  { %s35_s30 = sshll.u32 %s1291_s29, 4  ;;  %s1292_s5 = smov [#allocation11]   ;;  %s36_s30 = int_to_ptr.vmem [resolvable:$true] %s35_s30 }
  0x12   :  { %38 = dma.hbm_to_vmem [thread:$0]  %s34_s26, 16, %s36_s30, [#allocation7]  }
  0x13   :  { %s58_s10 = sshll.u32 %s1292_s5, 4  ;;  %s1293_s11 = smov 64   ;;  %s59_s10 = int_to_ptr.vmem [resolvable:$true] %s58_s10 }
  0x14   :  { %s1294_s12 = smov 4   ;;  %s84_s14 = sshll.u32 %s1412_s6, 4  ;;  %s85_s14 = int_to_ptr.hbm [resolvable:$true] %s84_s14 }
  0x15   :  { %64 = dma.hbm_to_vmem [thread:$0]  %s57_s28, 1024, %s59_s10, [#allocation10], %s1293_s11, %s1293_s11, %s1294_s12  }
  0x16   :  { %s1295_s15 = smov [#allocation14]  }
  0x17   :  { %s86_s16 = sshll.u32 %s1295_s15, 4  ;;  %s87_s16 = int_to_ptr.vmem [resolvable:$true] %s86_s16 }
  0x18   :  { %92 = dma.hbm_to_vmem [thread:$0]  %s85_s14, 1024, %s87_s16, [#allocation13], %s1293_s11, %s1293_s11, %s1294_s12  }
  0x19   :  { %1276 = dma.done.wait [#allocation7], 16  }
  0x1a   :  { %1277 = vsyncadd [#allocation7], 4294967280 }
  0x1b   :  { %1278 = dma.done.wait [#allocation10], 1920  }
  0x1c   :  { %1279 = vsyncadd [#allocation10], 4294965376 }
  0x1d   :  { %1280 = dma.done.wait [#allocation13], 1920  }
  0x1e   :  { %1281 = vsyncadd [#allocation13], 4294965376  ;;  %s1366_s3 = sld [smem:[#allocation5]]  ;;  %v1028_v0 = vld [vmem:[#allocation11 + $0x38] sm:$0xff]  ;;  %v1027_v1 = vld [vmem:[#allocation11 + $0x30] sm:$0xff]  ;;  %vm719_vm0 = vcmask 1045504  }
  0x1f   :  { %189 = vmatpush.bf16.msra.mxu0 %v1028_v0  ;;  %v116_v2 = vld [vmem:[#allocation6] sm:$0x1]  ;;  %v1036_v3 = vld [vmem:[#allocation11 + $0x38] sm:$0xff]  ;;  %v1035_v4 = vld [vmem:[#allocation11 + $0x30] sm:$0xff]  ;;  %s1369_s17 = sld [smem:[#allocation5 + $0x1]]  ;;  %s1296_s12 = smov [#allocation16]  }
  0x20   :  { %118 = vst [vmem:[#allocation2] sm:$0x1] %v116_v2  ;;  %275 = vmatpush.bf16.msra.mxu1 %v1036_v3  ;;  %v1026_v6 = vld [vmem:[#allocation11 + $0x28] sm:$0xff]  ;;  %v1025_v8 = vld [vmem:[#allocation11 + $0x20] sm:$0xff]  ;;  %v1024_v10 = vld [vmem:[#allocation11 + $0x18] sm:$0xff]  ;;  %v122_v16 = vpack.c.bf16 %v116_v2, %v116_v2  ;;  %s1379_s21 = sld [smem:[#allocation5 + $0x2]] }
  0x21   :  { %v1034_v7 = vld [vmem:[#allocation11 + $0x28] sm:$0xff]  ;;  %v1033_v9 = vld [vmem:[#allocation11 + $0x20] sm:$0xff]  ;;  %v1032_v11 = vld [vmem:[#allocation11 + $0x18] sm:$0xff]  ;;  %s1384_s23 = sld [smem:[#allocation5 + $0x3]]  ;;  %s761_s13 = sshll.u32 %s1296_s12, 4  ;;  %s762_s13 = int_to_ptr.vmem [resolvable:$true] %s761_s13 }
  0x22   :  { %v1023_v12 = vld [vmem:[#allocation11 + $0x10] sm:$0xff]  ;;  %v1022_v14 = vld [vmem:[#allocation11 + $0x8] sm:$0xff]  ;;  %v1021_v15 = vld [vmem:[#allocation11] sm:$0xff]  ;;  %s1389_s26 = sld [smem:[#allocation5 + $0x4]]  ;;  %s1297_s15 = smov [#allocation15]  }
  0x23   :  { %190 = vmatpush.bf16.msra.mxu0 %v1027_v1  ;;  %v1031_v13 = vld [vmem:[#allocation11 + $0x10] sm:$0xff]  ;;  %v1030_v17 = vld [vmem:[#allocation11 + $0x8] sm:$0xff]  ;;  %v1029_v18 = vld [vmem:[#allocation11] sm:$0xff]  ;;  %s956_s28 = sld [smem:[#allocation5 + $0x5]]  ;;  %s750_s16 = sshll.u32 %s1297_s15, 4  ;;  %s751_s16 = int_to_ptr.vmem [resolvable:$true] %s750_s16 }
  0x24   :  { %s119_s6 = scalar_lea.vmem [#allocation12], %s1366_s3  ;;  %276 = vmatpush.bf16.msra.mxu1 %v1035_v4  ;;  %v1044_v19 = vld [vmem:[#allocation11 + $0x38] sm:$0xff]  ;;  %v1043_v20 = vld [vmem:[#allocation11 + $0x30] sm:$0xff]  ;;  %v1042_v22 = vld [vmem:[#allocation11 + $0x28] sm:$0xff]  ;;  %s139_s18 = scalar_lea.vmem [#allocation9], %s1366_s3 }
  0x25   :  { %v120_v5 = vld [vmem:[%s119_s6] sm:$0x1]  ;;  %361 = vmatpush.bf16.msra.mxu2 %v1044_v19  ;;  %s205_s0 = scalar_lea.vmem [#allocation12], %s1369_s17  ;;  %v1041_v23 = vld [vmem:[#allocation11 + $0x20] sm:$0xff]  ;;  %v1040_v24 = vld [vmem:[#allocation11 + $0x18] sm:$0xff]  ;;  %s225_s22 = scalar_lea.vmem [#allocation9], %s1369_s17 }
  0x26   :  { %121 = vst [vmem:[#allocation3] sm:$0x1] %v120_v5  ;;  %v206_v21 = vld [vmem:[%s205_s0] sm:$0x1]  ;;  %v1038_v33 = vld [vmem:[#allocation11 + $0x8] sm:$0xff]  ;;  %v1037_v34 = vld [vmem:[#allocation11] sm:$0xff] }
  0x27   :  { %191 = vmatpush.bf16.msra.mxu0 %v1026_v6  ;;  %207 = vst [vmem:[#allocation3 + $0x1] sm:$0x1] %v206_v21  ;;  %v1039_v25 = vld [vmem:[#allocation11 + $0x10] sm:$0xff]  ;;  %v1052_v35 = vld [vmem:[#allocation11 + $0x38] sm:$0xff]  ;;  %v1050_v38 = vld [vmem:[#allocation11 + $0x28] sm:$0xff]  ;;  %s377_s24 = scalar_lea.vmem [#allocation12], %s1384_s23 }
  0x28   :  { %277 = vmatpush.bf16.msra.mxu1 %v1034_v7  ;;  %v140_v26 = vld [vmem:[%s139_s18] sm:$0x1]  ;;  %447 = vmatpush.bf16.msra.mxu3 %v1052_v35  ;;  %v1049_v39 = vld [vmem:[#allocation11 + $0x20] sm:$0xff]  ;;  %v1048_v40 = vld [vmem:[#allocation11 + $0x18] sm:$0xff]  ;;  %s311_s25 = scalar_lea.vmem [#allocation9], %s1379_s21  ;;  %s463_s2 = scalar_lea.vmem [#allocation12], %s1389_s26 }
  0x29   :  { %362 = vmatpush.bf16.msra.mxu2 %v1043_v20  ;;  %v1376_v27 = vld [vmem:[%s1410_s4] sm:$0x1]  ;;  %s291_s4 = scalar_lea.vmem [#allocation12], %s1379_s21  ;;  %v1046_v48 = vld [vmem:[#allocation11 + $0x8] sm:$0xff]  ;;  %v1045_v49 = vld [vmem:[#allocation11] sm:$0xff]  ;;  %s397_s27 = scalar_lea.vmem [#allocation9], %s1384_s23 }
  0x2a   :  { %v1051_v36 = vld [vmem:[#allocation11 + $0x30] sm:$0xff]  ;;  %v1060_v50 = vld [vmem:[#allocation11 + $0x38] sm:$0xff]  ;;  %v1058_v53 = vld [vmem:[#allocation11 + $0x28] sm:$0xff]  ;;  %s549_s29 = scalar_lea.vmem [#allocation12], %s956_s28  ;;  %s483_s30 = scalar_lea.vmem [#allocation9], %s1389_s26 }
  0x2b   :  { %192 = vmatpush.bf16.msra.mxu0 %v1025_v8  ;;  %v292_v37 = vld [vmem:[%s291_s4] sm:$0x1]  ;;  %v1057_v54 = vld [vmem:[#allocation11 + $0x20] sm:$0xff]  ;;  %v1056_v55 = vld [vmem:[#allocation11 + $0x18] sm:$0xff]  ;;  %s569_s5 = scalar_lea.vmem [#allocation9], %s956_s28  ;;  %s752_s6 = sshll.u32 %s1414_s8, 4  ;;  %s753_s6 = int_to_ptr.hbm [resolvable:$true] %s752_s6 }
  0x2c   :  { %278 = vmatpush.bf16.msra.mxu1 %v1033_v9  ;;  %293 = vst [vmem:[#allocation3 + $0x2] sm:$0x1] %v292_v37  ;;  %448 = vmatpush.bf16.msra.mxu3 %v1051_v36  ;;  %v1047_v41 = vld [vmem:[#allocation11 + $0x10] sm:$0xff]  ;;  %v1054_v63 = vld [vmem:[#allocation11 + $0x8] sm:$0xff]  ;;  %v1053_v0 = vld [vmem:[#allocation11] sm:$0xff] }
  0x2d   :  { %363 = vmatpush.bf16.msra.mxu2 %v1042_v22  ;;  %v226_v42 = vld [vmem:[%s225_s22] sm:$0x1]  ;;  %v1068_v1 = vld [vmem:[#allocation11 + $0x38] sm:$0xff]  ;;  %v1075_v4 = vld [vmem:[#allocation14 + $0x30] sm:$0xff] }
  0x2e   :  { %v1059_v51 = vld [vmem:[#allocation11 + $0x30] sm:$0xff]  ;;  %v1066_v6 = vld [vmem:[#allocation11 + $0x28] sm:$0xff]  ;;  %v1074_v7 = vld [vmem:[#allocation14 + $0x28] sm:$0xff] }
  0x2f   :  { %193 = vmatpush.bf16.msra.mxu0 %v1024_v10  ;;  %v378_v52 = vld [vmem:[%s377_s24] sm:$0x1]  ;;  %v1065_v8 = vld [vmem:[#allocation11 + $0x20] sm:$0xff]  ;;  %v1073_v9 = vld [vmem:[#allocation14 + $0x20] sm:$0xff] }
  0x30   :  { %279 = vmatpush.bf16.msra.mxu1 %v1032_v11  ;;  %449 = vmatpush.bf16.msra.mxu3 %v1050_v38  ;;  %379 = vst [vmem:[#allocation3 + $0x3] sm:$0x1] %v378_v52  ;;  %v1055_v56 = vld [vmem:[#allocation11 + $0x10] sm:$0xff]  ;;  %v1064_v10 = vld [vmem:[#allocation11 + $0x18] sm:$0xff]  ;;  %v1061_v20 = vld [vmem:[#allocation11] sm:$0xff] }
  0x31   :  { %364 = vmatpush.bf16.msra.mxu2 %v1041_v23  ;;  %v312_v57 = vld [vmem:[%s311_s25] sm:$0x1]  ;;  %v1071_v21 = vld [vmem:[#allocation14 + $0x10] sm:$0xff]  ;;  %v1070_v22 = vld [vmem:[#allocation14 + $0x8] sm:$0xff] }
  0x32   :  { %v1076_v2 = vld [vmem:[#allocation14 + $0x38] sm:$0xff]  ;;  %v1069_v23 = vld [vmem:[#allocation14] sm:$0xff] }
  0x33   :  { %194 = vmatpush.bf16.msra.mxu0 %v1023_v12  ;;  %v1067_v3 = vld [vmem:[#allocation11 + $0x30] sm:$0xff] }
  0x34   :  { %280 = vmatpush.bf16.msra.mxu1 %v1031_v13  ;;  %450 = vmatpush.bf16.msra.mxu3 %v1049_v39  ;;  %v464_v5 = vld [vmem:[%s463_s2] sm:$0x1] }
  0x35   :  { %365 = vmatpush.bf16.msra.mxu2 %v1040_v24  ;;  %465 = vst [vmem:[#allocation3 + $0x4] sm:$0x1] %v464_v5  ;;  %v1063_v11 = vld [vmem:[#allocation11 + $0x10] sm:$0xff] }
  0x36   :  { %v398_v12 = vld [vmem:[%s397_s27] sm:$0x1] }
  0x37   :  { %195 = vmatpush.bf16.msra.mxu0 %v1022_v14  ;;  %v1072_v19 = vld [vmem:[#allocation14 + $0x18] sm:$0xff] }
  0x38   :  { %281 = vmatpush.bf16.msra.mxu1 %v1030_v17  ;;  %451 = vmatpush.bf16.msra.mxu3 %v1048_v40  ;;  %v550_v24 = vld [vmem:[%s549_s29] sm:$0x1] }
  0x39   :  { %366 = vmatpush.bf16.msra.mxu2 %v1039_v25  ;;  %551 = vst [vmem:[#allocation3 + $0x5] sm:$0x1] %v550_v24  ;;  %v484_v25 = vld [vmem:[%s483_s30] sm:$0x1] }
  0x3a   :  { %v1089_v40 = vld [vmem:[%s1413_s7] ss:$0 sm:$0xff]  ;;  %s763_s7 = sshll.u32 %s1415_s9, 4  ;;  %s764_s7 = int_to_ptr.hbm [resolvable:$true] %s763_s7 }
  0x3b   :  { %196 = vmatpush.bf16.msra.mxu0 %v1021_v15 }
  0x3c   :  { %282 = vmatpush.bf16.msra.mxu1 %v1029_v18  ;;  %452 = vmatpush.bf16.msra.mxu3 %v1047_v41  ;;  %v1062_v18 = vld [vmem:[#allocation11 + $0x8] sm:$0xff] }
  0x3d   :  { %367 = vmatpush.bf16.msra.mxu2 %v1038_v33 }
  0x3e   :  { %197 = vmatmul.bf16.vlgmr.msra.gmra.mxu0 %v122_v16 }
  0x3f   :  { %533 = vmatpush.bf16.msrb.mxu0 %v1060_v50 }
  0x40   :  { %453 = vmatpush.bf16.msra.mxu3 %v1046_v48  ;;  %619 = vmatpush.bf16.msrb.mxu1 %v1068_v1  ;;  %v652_v39 = vld [vmem:[#allocation3] sm:$0x3f] }
  0x41   :  { %368 = vmatpush.bf16.msra.mxu2 %v1037_v34  ;;  %v570_v34 = vld [vmem:[%s569_s5] sm:$0x1] }
  0x43   :  { %534 = vmatpush.bf16.msrb.mxu0 %v1059_v51 }
  0x44   :  { %454 = vmatpush.bf16.msra.mxu3 %v1045_v49  ;;  %620 = vmatpush.bf16.msrb.mxu1 %v1067_v3 }
  0x45   :  { %701 = vmatpush.bf16.msrb.mxu2 %v1076_v2 }
  0x47   :  { %535 = vmatpush.bf16.msrb.mxu0 %v1058_v53 }
  0x48   :  { %621 = vmatpush.bf16.msrb.mxu1 %v1066_v6 }
  0x49   :  { %702 = vmatpush.bf16.msrb.mxu2 %v1075_v4 }
  0x4b   :  { %536 = vmatpush.bf16.msrb.mxu0 %v1057_v54 }
  0x4c   :  { %622 = vmatpush.bf16.msrb.mxu1 %v1065_v8 }
  0x4d   :  { %703 = vmatpush.bf16.msrb.mxu2 %v1074_v7 }
  0x4f   :  { %537 = vmatpush.bf16.msrb.mxu0 %v1056_v55 }
  0x50   :  { %623 = vmatpush.bf16.msrb.mxu1 %v1064_v10 }
  0x51   :  { %704 = vmatpush.bf16.msrb.mxu2 %v1073_v9 }
  0x53   :  { %538 = vmatpush.bf16.msrb.mxu0 %v1055_v56 }
  0x54   :  { %624 = vmatpush.bf16.msrb.mxu1 %v1063_v11 }
  0x55   :  { %705 = vmatpush.bf16.msrb.mxu2 %v1072_v19 }
  0x57   :  { %539 = vmatpush.bf16.msrb.mxu0 %v1054_v63 }
  0x58   :  { %625 = vmatpush.bf16.msrb.mxu1 %v1062_v18 }
  0x59   :  { %706 = vmatpush.bf16.msrb.mxu2 %v1071_v21 }
  0x5b   :  { %540 = vmatpush.bf16.msrb.mxu0 %v1053_v0 }
  0x5c   :  { %626 = vmatpush.bf16.msrb.mxu1 %v1061_v20 }
  0x5d   :  { %707 = vmatpush.bf16.msrb.mxu2 %v1070_v22 }
  0x61   :  { %708 = vmatpush.bf16.msrb.mxu2 %v1069_v23 }
  0xbb   :  { %v198_v28 = vpop.f32.mrf.mxu0 }
  0xbc   :  { %v199_v29 = vadd.f32 %v198_v28, %v140_v26 }
  0xbe   :  { %v202_v30 = vadd.f32 %v199_v29, %v1376_v27 }
  0xc0   :  { %204 = vst [vmem:[#allocation2 + $0x1] sm:$0x1] %v202_v30  ;;  %v208_v31 = vpack.c.bf16 %v202_v30, %v202_v30 }
  0xc2   :  { %283 = vmatmul.bf16.vlgmr.msra.gmra.mxu1 %v208_v31 }
  0xc3   :  { %v200_v32 = vpop.f32.mrf.mxu0 }
 0x13f   :  { %v284_v43 = vpop.f32.mrf.mxu1 }
 0x140   :  { %v285_v44 = vadd.f32 %v284_v43, %v226_v42 }
 0x142   :  { %v288_v45 = vadd.f32 %v285_v44, %v1376_v27 }
 0x144   :  { %290 = vst [vmem:[#allocation2 + $0x2] sm:$0x1] %v288_v45  ;;  %v294_v46 = vpack.c.bf16 %v288_v45, %v288_v45 }
 0x146   :  { %369 = vmatmul.bf16.vlgmr.msra.gmra.mxu2 %v294_v46 }
 0x147   :  { %v286_v47 = vpop.f32.mrf.mxu1 }
 0x1c9   :  { %v370_v58 = vpop.f32.mrf.mxu2 }
 0x1ca   :  { %v371_v59 = vadd.f32 %v370_v58, %v312_v57 }
 0x1cc   :  { %v374_v60 = vadd.f32 %v371_v59, %v1376_v27 }
 0x1ce   :  { %376 = vst [vmem:[#allocation2 + $0x3] sm:$0x1] %v374_v60  ;;  %v380_v61 = vpack.c.bf16 %v374_v60, %v374_v60 }
 0x1d0   :  { %455 = vmatmul.bf16.vlgmr.msra.gmra.mxu3 %v380_v61 }
 0x1d1   :  { %v372_v62 = vpop.f32.mrf.mxu2 }
 0x253   :  { %v456_v13 = vpop.f32.mrf.mxu3 }
 0x254   :  { %v457_v14 = vadd.f32 %v456_v13, %v398_v12 }
 0x256   :  { %v460_v15 = vadd.f32 %v457_v14, %v1376_v27 }
 0x258   :  { %462 = vst [vmem:[#allocation2 + $0x4] sm:$0x1] %v460_v15  ;;  %v466_v16 = vpack.c.bf16 %v460_v15, %v460_v15 }
 0x25a   :  { %541 = vmatmul.bf16.vlgmr.msrb.gmra.mxu0 %v466_v16 }
 0x25b   :  { %v458_v17 = vpop.f32.mrf.mxu3 }
 0x2d7   :  { %v542_v26 = vpop.f32.mrf.mxu0 }
 0x2d8   :  { %v543_v28 = vadd.f32 %v542_v26, %v484_v25 }
 0x2da   :  { %v546_v29 = vadd.f32 %v543_v28, %v1376_v27 }
 0x2dc   :  { %548 = vst [vmem:[#allocation2 + $0x5] sm:$0x1] %v546_v29  ;;  %v552_v30 = vpack.c.bf16 %v546_v29, %v546_v29 }
 0x2de   :  { %627 = vmatmul.bf16.vlgmr.msrb.gmra.mxu1 %v552_v30 }
 0x2df   :  { %v544_v31 = vpop.f32.mrf.mxu0 }
 0x2e3   :  { %v634_v32 = vld [vmem:[#allocation2] sm:$0x3f] }
 0x2e4   :  { %v635_v33 = vpack.c.bf16 %v634_v32, %v634_v32 }
 0x2e6   :  { %709 = vmatmul.bf16.vlgmr.msrb.gmra.mxu2 %v635_v33 }
 0x35b   :  { %v628_v35 = vpop.f32.mrf.mxu1 }
 0x35c   :  { %v629_v36 = vadd.f32 %v628_v35, %v570_v34 }
 0x35e   :  { %v632_v37 = vadd.f32 %v629_v36, %v1376_v27 }
 0x360   :  { %633 = vst [vmem:[#allocation16] sm:$0x1] %v632_v37 }
 0x361   :  { %766 = dma.vmem_to_hbm [thread:$0]  %s762_s13, 16, %s764_s7, [#allocation17]  }
 0x363   :  { %v630_v38 = vpop.f32.mrf.mxu1 }
 0x369   :  { %v710_v41 = vpop.f32.mrf.mxu2 }
 0x36a   :  { %v711_v42 = vadd.f32 %v710_v41, %v652_v39 }
 0x36c   :  { %v718_v43 = vadd.f32 %v1089_v40, %v711_v42 }
 0x36e   :  { %v720_v44 = vsel %vm719_vm0, %v718_v43, -inf }
 0x36f   :  { %721 = vmax.xlane.f32.xlu0 %v720_v44 }
 0x371   :  { %v712_v45 = vpop.f32.mrf.mxu2 }
 0x3e2   :  { %v722_v46 = vpop.xlane.xlu0 %721 }
 0x3e3   :  { %v723_v47 = vsub.f32 %v718_v43, %v722_v46 }
 0x3e5   :  { %v724_v48 = vmul.f32 1.442695, %v723_v47 }
 0x3e7   :  { %1090 = vpow2.f32 %v724_v48 }
 0x3ed   :  { %v1091_v49 = vpop.eup %1090 }
 0x3ee   :  { %v726_v27 = vsel %vm719_vm0, %v1091_v49, 0.0 }
 0x3ef   :  { %727 = vadd.xlane.f32.xlu0 %v726_v27 }
 0x462   :  { %v728_v50 = vpop.xlane.xlu0 %727 }
 0x463   :  { %1092 = vrcp.f32 %v728_v50  ;;  %v740_v54 = vand.u32 2147483648, %v728_v50  ;;  %v738_v56 = vand.u32 2147483647, %v728_v50  ;;  %vm734_vm2 = vweird.f32 %v728_v50 }
 0x465   :  { %v741_v58 = vor.u32 1.1754944e-38, %v740_v54  ;;  %vm739_vm4 = vcmp.eq.f32.partialorder %v738_v56, 8.507059e+37 }
 0x469   :  { %v1093_v51 = vpop.eup %1092 }
 0x46a   :  { %v730_v52 = vmul.f32 %v1093_v51, %v728_v50  ;;  %vm735_vm1 = vweird.f32 %v1093_v51 }
 0x46b   :  { %vm736_vm3 = vmor %vm734_vm2, %vm735_vm1 }
 0x46c   :  { %v731_v53 = vsub.f32 1.0, %v730_v52 }
 0x46e   :  { %v732_v55 = vmul.f32 %v1093_v51, %v731_v53 }
 0x470   :  { %v733_v57 = vadd.f32 %v1093_v51, %v732_v55 }
 0x472   :  { %v737_v59 = vsel %vm736_vm3, %v1093_v51, %v733_v57 }
 0x473   :  { %v742_v60 = vsel %vm739_vm4, %v741_v58, %v737_v59 }
 0x474   :  { %v743_v61 = vmul.f32 %v1091_v49, %v742_v60 }
 0x476   :  { %744 = vst [vmem:[#allocation15] sm:$0x3f] %v743_v61 }
 0x477   :  { %755 = dma.vmem_to_hbm [thread:$0]  %s751_s16, 128, %s753_s6, [#allocation8]  }
 0x478   :  { %1282 = dma.done.wait [#allocation8], 128  }
 0x479   :  { %1283 = vsyncadd [#allocation8], 4294967168 }
 0x47a   :  { %1284 = dma.done.wait [#allocation17], 16  }
 0x47b   :  { %1285 = vsyncadd [#allocation17], 4294967280 }
 0x47c   :  { %775 = vsyncpa [#allocation7], 1 }
 0x47d   :  { %776 = vsyncpa [#allocation10], 1 }
 0x47e   :  { %777 = vsyncpa [#allocation13], 1 }
 0x47f   :  { %778 = vsyncpa [#allocation8], 1 }
 0x480   :  { %779 = vsyncpa [#allocation17], 1 }

</bundles_post_ra>
